<compile_context>
chip_gen: v5e
topology: v5e:2x2
jax: 0.10.0
libtpu: 0.0.40
codegen_flags: <defaults>
</compile_context>

<pallas_src>
import functools

import jax
import jax.numpy as jnp
from jax.experimental import pallas as pl
from jax.experimental.pallas import tpu as pltpu


def _round_up(x, m):
    return ((x + m - 1) // m) * m


def _pick_row_tile(m, cap=256):
    """Largest multiple-of-8 tile <= cap that divides m (None if m % 8 != 0)."""
    top = min(cap, m)
    top -= top % 8
    for t in range(top, 0, -8):
        if m % t == 0:
            return t
    return None


# ----------------------------------------------------------------------------
# Pallas kernels
# ----------------------------------------------------------------------------
def _matmul_epilogue_kernel(*refs, act, has_sc):
    """out = [relu]( A @ B + bias [+ shortcut] ), f32 accumulation."""
    if has_sc:
        a_ref, b_ref, bias_ref, sc_ref, o_ref = refs
    else:
        a_ref, b_ref, bias_ref, o_ref = refs
    y = jnp.dot(a_ref[...], b_ref[...], preferred_element_type=jnp.float32)
    y = y + bias_ref[...]
    if has_sc:
        y = y + sc_ref[...].astype(jnp.float32)
    if act:
        y = jnp.maximum(y, 0.0)
    o_ref[...] = y.astype(o_ref.dtype)


def matmul_bias_act(a, b, bias, act, shortcut=None, out_dtype=jnp.bfloat16):
    """(M,K) @ (K,N) + bias[N] [+ shortcut] [+ ReLU], bf16 MXU / f32 accum."""
    m, k = a.shape
    _, n = b.shape

    tm = _pick_row_tile(m, 256)
    if tm is None:  # ragged M (not hit on the hot path): pad up once
        tm = min(256, _round_up(m, 8))
        mp = _round_up(m, tm)
        a = jnp.pad(a, ((0, mp - m), (0, 0)))
        if shortcut is not None:
            shortcut = jnp.pad(shortcut, ((0, mp - m), (0, 0)))
    else:
        mp = m

    tn = n if n <= 256 else 256
    assert n % tn == 0

    a = a.astype(jnp.bfloat16)
    b = b.astype(jnp.bfloat16)
    bias2 = bias.reshape(1, n).astype(jnp.float32)

    in_specs = [
        pl.BlockSpec((tm, k), lambda i, j: (i, 0)),
        pl.BlockSpec((k, tn), lambda i, j: (0, j)),
        pl.BlockSpec((1, tn), lambda i, j: (0, j)),
    ]
    args = [a, b, bias2]
    if shortcut is not None:
        in_specs.append(pl.BlockSpec((tm, tn), lambda i, j: (i, j)))
        args.append(shortcut.astype(jnp.bfloat16))

    out = pl.pallas_call(
        functools.partial(_matmul_epilogue_kernel, act=act,
                          has_sc=shortcut is not None),
        out_shape=jax.ShapeDtypeStruct((mp, n), out_dtype),
        grid=(mp // tm, n // tn),
        in_specs=in_specs,
        out_specs=pl.BlockSpec((tm, tn), lambda i, j: (i, j)),
        compiler_params=pltpu.CompilerParams(
            dimension_semantics=("parallel", "parallel")),
    )(*args)
    return out[:m] if mp != m else out


def _conv_s1_kernel(*refs, taps, wp, kww, tm, act, has_sc):
    """Fused stride-1 conv: accumulate `taps` shifted matmuls over a padded,
    row-flattened input.  Tap (di,dj) is a constant row offset di*Wp + dj."""
    if has_sc:
        a_cur, a_nxt, w_ref, bias_ref, sc_ref, o_ref, a_win = refs
    else:
        a_cur, a_nxt, w_ref, bias_ref, o_ref, a_win = refs

    # Assemble a 2*tm row window so every shifted tap is a static slice.
    a_win[0:tm, :] = a_cur[...]
    a_win[tm:2 * tm, :] = a_nxt[...]

    acc = None
    for kk in range(taps):
        off = (kk // kww) * wp + (kk % kww)
        a = a_win[off:off + tm, :]
        part = jnp.dot(a, w_ref[kk], preferred_element_type=jnp.float32)
        acc = part if acc is None else acc + part

    y = acc + bias_ref[...]
    if has_sc:
        y = y + sc_ref[...].astype(jnp.float32)
    if act:
        y = jnp.maximum(y, 0.0)
    o_ref[...] = y.astype(o_ref.dtype)


_MAX_FUSED_TM = 1024  # fall back to im2col if the halo would exceed this


def conv2d_s1_fused(x, w, bias, pad, act, shortcut=None):
    """Stride-1 conv via the flattened-row constant-offset trick.

    Output is computed "full width" (Hp x Wp grid, garbage outside the valid
    Ho x Wo region) and the valid region is sliced out afterwards.
    Returns None if the configuration doesn't fit the fused scheme.
    """
    n, h, wd, cin = x.shape
    kh, kw, _, cout = w.shape
    hp, wp = h + 2 * pad, wd + 2 * pad
    ho, wo = hp - kh + 1, wp - kw + 1
    r = n * hp * wp
    off_max = (kh - 1) * wp + (kw - 1)

    tm = min(256, _round_up(r, 8))
    tm = max(tm, _round_up(off_max, 8))
    if tm > _MAX_FUSED_TM:
        return None

    ntiles = pl.cdiv(r, tm)
    rows_out = ntiles * tm
    rows_in = rows_out + tm          # one extra tile for the "next" block

    xpad = jnp.pad(x, ((0, 0), (pad, pad), (pad, pad), (0, 0))).astype(jnp.bfloat16)
    xflat = xpad.reshape(r, cin)
    xflat = jnp.pad(xflat, ((0, rows_in - r), (0, 0)))

    wf = w.reshape(kh * kw, cin, cout).astype(jnp.bfloat16)
    bias2 = bias.reshape(1, cout).astype(jnp.float32)

    tn = cout if cout <= 256 else 256
    assert cout % tn == 0

    in_specs = [
        pl.BlockSpec((tm, cin), lambda i, j: (i, 0)),       # current row tile
        pl.BlockSpec((tm, cin), lambda i, j: (i + 1, 0)),   # next row tile (halo)
        pl.BlockSpec((kh * kw, cin, tn), lambda i, j: (0, 0, j)),
        pl.BlockSpec((1, tn), lambda i, j: (0, j)),
    ]
    args = [xflat, xflat, wf, bias2]

    if shortcut is not None:
        # Place the dense shortcut at the full-width output positions.
        scp = jnp.pad(shortcut, ((0, 0), (0, hp - ho), (0, wp - wo), (0, 0)))
        scf = scp.reshape(r, cout).astype(jnp.bfloat16)
        scf = jnp.pad(scf, ((0, rows_out - r), (0, 0)))
        in_specs.append(pl.BlockSpec((tm, tn), lambda i, j: (i, j)))
        args.append(scf)

    yflat = pl.pallas_call(
        functools.partial(_conv_s1_kernel, taps=kh * kw, wp=wp, kww=kw,
                          tm=tm, act=act, has_sc=shortcut is not None),
        out_shape=jax.ShapeDtypeStruct((rows_out, cout), jnp.bfloat16),
        grid=(ntiles, cout // tn),
        in_specs=in_specs,
        out_specs=pl.BlockSpec((tm, tn), lambda i, j: (i, j)),
        scratch_shapes=[pltpu.VMEM((2 * tm, cin), jnp.bfloat16)],
        compiler_params=pltpu.CompilerParams(
            dimension_semantics=("parallel", "parallel")),
    )(*args)

    y = yflat[:r].reshape(n, hp, wp, cout)[:, :ho, :wo, :]
    return y


def _maxpool_kernel(ee_ref, eo_ref, oe_ref, oo_ref, o_ref, *, ho, wo):
    ee = ee_ref[...]
    eo = eo_ref[...]
    oe = oe_ref[...]
    oo = oo_ref[...]
    m = ee[:, 0:ho, 0:wo, :]
    m = jnp.maximum(m, ee[:, 0:ho, 1:wo + 1, :])
    m = jnp.maximum(m, ee[:, 1:ho + 1, 0:wo, :])
    m = jnp.maximum(m, ee[:, 1:ho + 1, 1:wo + 1, :])
    m = jnp.maximum(m, eo[:, 0:ho, 0:wo, :])
    m = jnp.maximum(m, eo[:, 1:ho + 1, 0:wo, :])
    m = jnp.maximum(m, oe[:, 0:ho, 0:wo, :])
    m = jnp.maximum(m, oe[:, 0:ho, 1:wo + 1, :])
    m = jnp.maximum(m, oo[:, 0:ho, 0:wo, :])
    o_ref[...] = m


def maxpool_3x3_s2_p1(x):
    """3x3 stride-2 pad-1 maxpool via polyphase (even/odd) split + one Pallas
    kernel doing the 9-way max with unit-shift slices (no 9x stacking)."""
    n, h, w, c = x.shape
    assert h % 2 == 0 and w % 2 == 0, "maxpool path expects even spatial dims"
    ho, wo = h // 2, w // 2
    xp = jnp.pad(x, ((0, 0), (1, 1), (1, 1), (0, 0)), constant_values=-jnp.inf)
    ee = xp[:, 0::2, 0::2, :]
    eo = xp[:, 0::2, 1::2, :]
    oe = xp[:, 1::2, 0::2, :]
    oo = xp[:, 1::2, 1::2, :]
    in_spec = pl.BlockSpec((1, ho + 1, wo + 1, c), lambda i: (i, 0, 0, 0))
    out = pl.pallas_call(
        functools.partial(_maxpool_kernel, ho=ho, wo=wo),
        out_shape=jax.ShapeDtypeStruct((n, ho, wo, c), x.dtype),
        grid=(n,),
        in_specs=[in_spec] * 4,
        out_specs=pl.BlockSpec((1, ho, wo, c), lambda i: (i, 0, 0, 0)),
        compiler_params=pltpu.CompilerParams(dimension_semantics=("parallel",)),
    )(ee, eo, oe, oo)
    return out


# ----------------------------------------------------------------------------
# Conv dispatcher (im2col fallback for stride-2 / stem; 1x1 via plain matmul)
# ----------------------------------------------------------------------------
def conv2d_bn_act(x, w, bias, stride, pad, act, shortcut=None):
    """x: (N,H,W,Cin) bf16 NHWC, w: (KH,KW,Cin,Cout) BN-folded, b: (Cout,).
    Optional `shortcut` (N,Ho,Wo,Cout) is added before the ReLU (residual)."""
    n, h, wd, cin = x.shape
    kh, kw, _, cout = w.shape

    # 1x1 convs: subsample spatially (stride) then a plain matmul.
    if kh == 1 and kw == 1 and pad == 0:
        xs = x[:, ::stride, ::stride, :] if stride > 1 else x
        nb, ho, wo, _ = xs.shape
        a = xs.reshape(nb * ho * wo, cin)
        sc = None if shortcut is None else shortcut.reshape(nb * ho * wo, cout)
        y = matmul_bias_act(a, w.reshape(cin, cout), bias, act, sc)
        return y.reshape(nb, ho, wo, cout)

    # Stride-1 kxk convs: fused window-loop kernel (no im2col in HBM).
    if stride == 1:
        y = conv2d_s1_fused(x, w, bias, pad, act, shortcut)
        if y is not None:
            return y

    # Fallback: im2col + fused matmul epilogue (7x7 stem, 3x3 stride-2 convs).
    xp = jnp.pad(x, ((0, 0), (pad, pad), (pad, pad), (0, 0)))
    ho = (h + 2 * pad - kh) // stride + 1
    wo = (wd + 2 * pad - kw) // stride + 1
    cols = []
    for i in range(kh):
        for j in range(kw):
            cols.append(xp[:, i:i + stride * ho:stride, j:j + stride * wo:stride, :])
    patches = jnp.concatenate(cols, axis=-1)            # (N,Ho,Wo,KH*KW*Cin)
    a = patches.reshape(n * ho * wo, kh * kw * cin)
    sc = None if shortcut is None else shortcut.reshape(n * ho * wo, cout)
    y = matmul_bias_act(a, w.reshape(kh * kw * cin, cout), bias, act, sc)
    return y.reshape(n, ho, wo, cout)


# ----------------------------------------------------------------------------
# Deterministic parameter init (BN folded into conv -> weight + bias)
# ----------------------------------------------------------------------------
_EPS = 1e-5


def _fold_bn(w, gamma, beta, mean, var):
    scale = gamma / jnp.sqrt(var + _EPS)          # (Cout,)
    return w * scale, beta - mean * scale


def init_conv_bn(key, cin, cout, k):
    k1, k2, k3, k4, k5 = jax.random.split(key, 5)
    fan = k * k * cin
    w = jax.random.normal(k1, (k, k, cin, cout), jnp.float32) * (2.0 / fan) ** 0.5
    gamma = 1.0 + 0.1 * jax.random.normal(k2, (cout,), jnp.float32)
    beta = 0.1 * jax.random.normal(k3, (cout,), jnp.float32)
    mean = 0.1 * jax.random.normal(k4, (cout,), jnp.float32)
    var = 1.0 + 0.1 * jax.random.uniform(k5, (cout,), jnp.float32)
    return _fold_bn(w, gamma, beta, mean, var)


def init_basic_block(key, cin, cout, stride):
    keys = jax.random.split(key, 3)
    p = {}
    p["w1"], p["b1"] = init_conv_bn(keys[0], cin, cout, 3)
    p["w2"], p["b2"] = init_conv_bn(keys[1], cout, cout, 3)
    if stride != 1 or cin != cout:
        p["wd"], p["bd"] = init_conv_bn(keys[2], cin, cout, 1)
    return (p, stride)


def init_resnet18(key):
    keys = jax.random.split(key, 9)
    params = {"stem": init_conv_bn(keys[0], 3, 64, 7)}
    layers = []
    cfg = [(64, 64, 1), (64, 128, 2), (128, 256, 2), (256, 512, 2)]
    ki = 1
    for cin, cout, s in cfg:
        b1 = init_basic_block(keys[ki], cin, cout, s); ki += 1
        b2 = init_basic_block(keys[ki], cout, cout, 1); ki += 1
        layers.append((b1, b2))
    params["layers"] = layers
    return params


# ----------------------------------------------------------------------------
# Forward (mirrors ResNetBackbone.forward with version='18')
# ----------------------------------------------------------------------------
def basic_block_forward(x, blk):
    p, stride = blk
    h = conv2d_bn_act(x, p["w1"], p["b1"], stride, 1, act=True)
    if "wd" in p:
        sc = conv2d_bn_act(x, p["wd"], p["bd"], stride, 0, act=False)
    else:
        sc = x
    # conv2 + BN + residual add + ReLU all fused in one kernel epilogue.
    return conv2d_bn_act(h, p["w2"], p["b2"], 1, 1, act=True, shortcut=sc)


def run_layer(x, layer):
    for blk in layer:
        x = basic_block_forward(x, blk)
    return x


def _to_nchw_f32(x_nhwc):
    return jnp.transpose(x_nhwc, (0, 3, 1, 2)).astype(jnp.float32)


def resnet_backbone_forward(x_nchw, params, out_levels=(5,)):
    """x_nchw: (N, 3, H, W). Returns list of NCHW features (PyTorch semantics).

    Stages: 1 = conv7x7/bn/relu, 2 = maxpool+layer1, 3 = layer2,
            4 = layer3, 5 = layer4.
    # TODO(synk): BatchNorm is evaluated in inference mode (running stats
    # folded into the conv); train-mode batch statistics are not reproduced.
    """
    features = []
    if out_levels[0] == 0:
        features.append(x_nchw)

    x = jnp.transpose(x_nchw, (0, 2, 3, 1)).astype(jnp.bfloat16)  # -> NHWC bf16

    # stage 1: conv1 + bn1 + relu (7x7 stride-2; im2col path)
    w, b = params["stem"]
    x = conv2d_bn_act(x, w, b, stride=2, pad=3, act=True)
    if 1 in out_levels:
        features.append(_to_nchw_f32(x))

    # stage 2: maxpool + layer1
    x = maxpool_3x3_s2_p1(x)
    x = run_layer(x, params["layers"][0])
    if 2 in out_levels:
        features.append(_to_nchw_f32(x))

    # stages 3..5: layer2..layer4
    for li in range(1, 4):
        x = run_layer(x, params["layers"][li])
        if li + 2 in out_levels:
            features.append(_to_nchw_f32(x))

    return features


if __name__ == "__main__":
    key = jax.random.PRNGKey(0)
    kp, kx = jax.random.split(key)
    params = init_resnet18(kp)

    # Small input consistent with the module: NCHW, reduction factor 2**5 = 32.
    x = jax.random.normal(kx, (2, 3, 64, 64), jnp.float32)

    feats = resnet_backbone_forward(x, params, out_levels=(5,))
    feats = jax.block_until_ready(feats)

    assert len(feats) == 1
    assert feats[0].shape == (2, 512, 2, 2), feats[0].shape
    assert bool(jnp.all(jnp.isfinite(feats[0])))
    print("KERNEL_OK")
</pallas_src>

<mosaic_0001>
module attributes {stable_mosaic.version = 11 : i64} {
  func.func @_matmul_epilogue_kernel(%arg0: i32, %arg1: i32, %arg2: memref<256x147xbf16, #tpu.memory_space<vmem>>, %arg3: memref<147x64xbf16, #tpu.memory_space<vmem>>, %arg4: memref<1x64xf32, #tpu.memory_space<vmem>>, %arg5: memref<256x64xbf16, #tpu.memory_space<vmem>>) attributes {dimension_semantics = [#tpu.dimension_semantics<parallel>, #tpu.dimension_semantics<parallel>], iteration_bounds = array<i64: 8, 1>, scalar_prefetch = 0 : i64, scratch_operands = 0 : i64, tpu.core_type = #tpu.core_type<tc>, window_params = [{transform_indices = @transform_0, window_bounds = array<i64: 256, 147>}, {transform_indices = @transform_1, window_bounds = array<i64: 147, 64>}, {transform_indices = @transform_2, window_bounds = array<i64: 1, 64>}, {transform_indices = @transform_3, window_bounds = array<i64: 256, 64>}]} {
    %c0 = arith.constant 0 : index
    %c0_0 = arith.constant 0 : index
    %0 = vector.load %arg2[%c0, %c0_0] : memref<256x147xbf16, #tpu.memory_space<vmem>>, vector<256x147xbf16>
    %c0_1 = arith.constant 0 : index
    %c0_2 = arith.constant 0 : index
    %1 = vector.load %arg3[%c0_1, %c0_2] : memref<147x64xbf16, #tpu.memory_space<vmem>>, vector<147x64xbf16>
    %cst = arith.constant dense<0.000000e+00> : vector<256x64xf32>
    %2 = tpu.matmul %0, %1, %cst {dimension_numbers = #tpu.dot_dimension_numbers<[1], [0], [0], [1], [0, 0, 1, 1], [], []>} : vector<256x147xbf16>, vector<147x64xbf16>, vector<256x64xf32> -> vector<256x64xf32>
    %c0_3 = arith.constant 0 : index
    %c0_4 = arith.constant 0 : index
    %3 = vector.load %arg4[%c0_3, %c0_4] : memref<1x64xf32, #tpu.memory_space<vmem>>, vector<1x64xf32>
    %4 = vector.broadcast %3 : vector<1x64xf32> to vector<256x64xf32>
    %5 = arith.addf %2, %4 : vector<256x64xf32>
    %cst_5 = arith.constant 0.000000e+00 : f32
    %6 = vector.broadcast %cst_5 : f32 to vector<256x64xf32>
    %7 = arith.maximumf %5, %6 : vector<256x64xf32>
    %8 = arith.truncf %7 : vector<256x64xf32> to vector<256x64xbf16>
    %c0_6 = arith.constant 0 : index
    %c0_7 = arith.constant 0 : index
    %9 = vector.load %arg5[%c0_6, %c0_7] : memref<256x64xbf16, #tpu.memory_space<vmem>>, vector<256x64xbf16>
    tpu.vector_store %arg5[%c0_6, %c0_7], %8 {strides = array<i32>} : memref<256x64xbf16, #tpu.memory_space<vmem>>, vector<256x64xbf16>,
    return
  }
  func.func @transform_0(%arg0: i32, %arg1: i32) -> (i32, i32) {
    %c0_i32 = arith.constant 0 : i32
    %c0_i32_0 = arith.constant 0 : i32
    return %arg0, %c0_i32 : i32, i32
  }
  func.func @transform_1(%arg0: i32, %arg1: i32) -> (i32, i32) {
    %c0_i32 = arith.constant 0 : i32
    %c0_i32_0 = arith.constant 0 : i32
    return %c0_i32, %arg1 : i32, i32
  }
  func.func @transform_2(%arg0: i32, %arg1: i32) -> (i32, i32) {
    %c0_i32 = arith.constant 0 : i32
    %c0_i32_0 = arith.constant 0 : i32
    return %c0_i32, %arg1 : i32, i32
  }
  func.func @transform_3(%arg0: i32, %arg1: i32) -> (i32, i32) {
    %c0_i32 = arith.constant 0 : i32
    return %arg0, %arg1 : i32, i32
  }
}

</mosaic_0001>

<bundles_post_ra>
// kernel: tpu_custom_call.1
= control target key start
LH: loop header
LB: loop body
LE: loop exit
PB: predicated region body
PF: predicated region fallthrough
CT: control target
= control target key end

     0   :  { %s1235_s12 = smov 0   ;;  %s1237_s13 = smov 0   ;;  %s1493_s0 = inlined_call_operand.vmem [shape: bf16[2048,147], index: 0, kind: input, shape index: {}]   ;;  %s1494_s1 = inlined_call_operand.vmem [shape: bf16[147,64], index: 1, kind: input, shape index: {}]   ;;  %s1495_s2 = inlined_call_operand.vmem [shape: f32[1,64], index: 2, kind: input, shape index: {}]   ;;  %s1496_s3 = inlined_call_operand.vmem [shape: bf16[2048,64], index: 3, kind: output, shape index: {}]  }
   0x1   :  { %s1239_s14 = smov 0  }
   0x2 LB: > { %s25_s15 = sadd.s32 1, %s1208_s13  ;;  %p924_p0 = scmp.ge.s32.totalorder %s1212_s14, 1  ;;  %s1212_s14 = sphi %s1239_s14, %s13_s14   ;;  %s1208_s13 = sphi %s1237_s13, %s1498_s13   ;;  %s1204_s12 = sphi %s1235_s12, %s1497_s12  }
   0x3   : > { %p27_p1 = scmp.ge.s32.totalorder %s25_s15, 8  ;;  %p170_p2 = scmp.lt.s32.totalorder %s1212_s14, 9 }
   0x5   : > { %s1500_s15 = smov (%p27_p1, %s25_s15), 0  ;;  %p171_p3 = pnand %p924_p0, %p170_p2 }
   0x6   : > { %s925_s20 = sshll.u32 (!%p171_p3), %s1204_s12, 5 }
   0x7   : > { %174 = sbr.rel (%p171_p3) target bundleno = 305 (0x131), region = 32  ;;  %p206_p4 = scmp.lt.s32.totalorder (!%p171_p3), %s925_s20, 255 }
   0xc   : > { %v1152_v0 = vld [vmem:[%s1494_s1 + $0x38] sm:$0xff]  ;;  %v279_v1 = vld [vmem:[%s1494_s1 + $0x48] sm:$0x3]  ;;  %vm534_vm0 = vcmask 1040384   ;;  %vm535_vm1 = vcmask 1041408   ;;  %v1151_v3 = vld [vmem:[%s1494_s1 + $0x30] sm:$0xff] }
   0xd   : > { %v465_v2 = vunpack.c.l.b16 %v279_v1  ;;  %541 = vmatpush.bf16.msra.mxu0 %v1152_v0  ;;  %1154 = vmatpush.bf16.msra.mxu2 %v1152_v0  ;;  %v1214_v4 = vmov 65535   ;;  %s1502_s20 = smov (!%p206_p4, %s925_s20), 255  ;;  %v1150_v9 = vld [vmem:[%s1494_s1 + $0x28] sm:$0xff]  ;;  %v1153_v10 = vld [vmem:[%s1494_s1 + $0x40] sm:$0xff]  ;;  %vm485_vm2 = vcmask 154624   ;;  %v1148_v18 = vld [vmem:[%s1494_s1 + $0x18] sm:$0xff] }
   0xe   : > { %v536_v5 = vsel %vm534_vm0, 4294967295, %v1214_v4  ;;  %s1112_s25 = sshll.u32 %s1502_s20, 3  ;;  %v1149_v14 = vld [vmem:[%s1494_s1 + $0x20] sm:$0xff]  ;;  %v1147_v19 = vld [vmem:[%s1494_s1 + $0x10] sm:$0xff]  ;;  %v1146_v20 = vld [vmem:[%s1494_s1 + $0x8] sm:$0xff]  ;;  %s929_s19 = sshll.u32 %s1502_s20, 2 }
   0xf   : > { %v475_v6 = vpack.c.b16 %v465_v2, %v465_v2  ;;  %v537_v7 = vsel %vm535_vm1, %v536_v5, 0  ;;  %s1274_s30 = scalar_lea.vmem %s1493_s0, %s1112_s25  ;;  %v1145_v26 = vld [vmem:[%s1494_s1] sm:$0xff]  ;;  %s1381_s23 = scalar_lea.vmem %s1496_s3, %s929_s19  ;;  %vm783_vm3 = vcmask 519168  }
  0x10   : > { %v1113_v11 = vld [vmem:[%s1274_s30 + $0x4] sm:$0xf]  ;;  %v934_v12 = vld [vmem:[%s1274_s30 + $0x8] sm:$0xf0]  ;;  %v1131_v15 = vld [vmem:[%s1274_s30 + $0x94] sm:$0xf] }
  0x11   : > { %v539_v8 = vand.u32 %v537_v7, %v475_v6  ;;  %542 = vmatpush.bf16.msra.mxu0 %v1151_v3  ;;  %1155 = vmatpush.bf16.msra.mxu2 %v1151_v3  ;;  %v937_v13 = vor.u32 %v1113_v11, %v934_v12  ;;  %v1006_v16 = vld [vmem:[%s1274_s30 + $0x98] sm:$0xf0]  ;;  %v1115_v21 = vld [vmem:[%s1274_s30 + $0x14] sm:$0xf]  ;;  %v1133_v23 = vld [vmem:[%s1274_s30 + $0xa4] sm:$0xf] }
  0x12   : > { %v1009_v17 = vor.u32 %v1131_v15, %v1006_v16  ;;  %v942_v22 = vld [vmem:[%s1274_s30 + $0x18] sm:$0xf0]  ;;  %v1014_v24 = vld [vmem:[%s1274_s30 + $0xa8] sm:$0xf0]  ;;  %v932_v27 = vld [vmem:[%s1274_s30] sm:$0xf] }
  0x13   : > { %636 = vmatpush.bf16.msra.mxu1 %v539_v8  ;;  %1162 = vmatpush.bf16.msra.mxu3 %v539_v8  ;;  %v945_v25 = vor.u32 %v1115_v21, %v942_v22  ;;  %v1114_v28 = vld [vmem:[%s1274_s30 + $0x4] sm:$0xf0]  ;;  %v996_v29 = vld [vmem:[%s1274_s30 + $0x80] sm:$0xf]  ;;  %v1017_v31 = vor.u32 %v1133_v23, %v1014_v24  ;;  %v1117_v34 = vld [vmem:[%s1274_s30 + $0x24] sm:$0xf] }
  0x14   : > { %v1130_v30 = vld [vmem:[%s1274_s30 + $0x84] sm:$0xf0]  ;;  %v933_v32 = vor.u32 %v1114_v28, %v932_v27  ;;  %v950_v35 = vld [vmem:[%s1274_s30 + $0x28] sm:$0xf0]  ;;  %v1135_v36 = vld [vmem:[%s1274_s30 + $0xb4] sm:$0xf] }
  0x15   : > { %543 = vmatpush.bf16.msra.mxu0 %v1150_v9  ;;  %1156 = vmatpush.bf16.msra.mxu2 %v1150_v9  ;;  %v997_v33 = vor.u32 %v1130_v30, %v996_v29  ;;  %v1022_v37 = vld [vmem:[%s1274_s30 + $0xb8] sm:$0xf0]  ;;  %v953_v38 = vor.u32 %v1117_v34, %v950_v35  ;;  %v940_v39 = vld [vmem:[%s1274_s30 + $0x10] sm:$0xf]  ;;  %v1116_v40 = vld [vmem:[%s1274_s30 + $0x14] sm:$0xf0] }
  0x16   : > { %v1004_v41 = vld [vmem:[%s1274_s30 + $0x90] sm:$0xf]  ;;  %v1132_v42 = vld [vmem:[%s1274_s30 + $0x94] sm:$0xf0]  ;;  %v1025_v43 = vor.u32 %v1135_v36, %v1022_v37  ;;  %v941_v44 = vor.u32 %v1116_v40, %v940_v39  ;;  %v1119_v46 = vld [vmem:[%s1274_s30 + $0x34] sm:$0xf] }
  0x17   : > { %637 = vmatpush.bf16.msra.mxu1 %v1153_v10  ;;  %1163 = vmatpush.bf16.msra.mxu3 %v1153_v10  ;;  %v1005_v45 = vor.u32 %v1132_v42, %v1004_v41  ;;  %v958_v47 = vld [vmem:[%s1274_s30 + $0x38] sm:$0xf0]  ;;  %v1137_v48 = vld [vmem:[%s1274_s30 + $0xc4] sm:$0xf]  ;;  %v1030_v49 = vld [vmem:[%s1274_s30 + $0xc8] sm:$0xf0] }
  0x18   : > { %v961_v50 = vor.u32 %v1119_v46, %v958_v47  ;;  %v948_v51 = vld [vmem:[%s1274_s30 + $0x20] sm:$0xf]  ;;  %v1118_v52 = vld [vmem:[%s1274_s30 + $0x24] sm:$0xf0]  ;;  %v1033_v55 = vor.u32 %v1137_v48, %v1030_v49  ;;  %v1121_v58 = vld [vmem:[%s1274_s30 + $0x44] sm:$0xf] }
  0x19   : > { %544 = vmatpush.bf16.msra.mxu0 %v1149_v14  ;;  %1157 = vmatpush.bf16.msra.mxu2 %v1149_v14  ;;  %v1012_v53 = vld [vmem:[%s1274_s30 + $0xa0] sm:$0xf]  ;;  %v1134_v54 = vld [vmem:[%s1274_s30 + $0xa4] sm:$0xf0]  ;;  %v949_v56 = vor.u32 %v1118_v52, %v948_v51  ;;  %v966_v59 = vld [vmem:[%s1274_s30 + $0x48] sm:$0xf0] }
  0x1a   : > { %1094 = vmatmul.msk.bf16.vlgmr.msra.gmra.mxu1 %vm485_vm2, %v937_v13  ;;  %1103 = vmatmul.msk.bf16.vlgmr.msra.gmra.mxu3 %vm485_vm2, %v1009_v17  ;;  %v1013_v57 = vor.u32 %v1134_v54, %v1012_v53  ;;  %v1139_v60 = vld [vmem:[%s1274_s30 + $0xd4] sm:$0xf]  ;;  %v1038_v61 = vld [vmem:[%s1274_s30 + $0xd8] sm:$0xf0]  ;;  %v969_v62 = vor.u32 %v1121_v58, %v966_v59  ;;  %v956_v63 = vld [vmem:[%s1274_s30 + $0x30] sm:$0xf] }
  0x1b   : > { %v1120_v0 = vld [vmem:[%s1274_s30 + $0x34] sm:$0xf0]  ;;  %v1020_v1 = vld [vmem:[%s1274_s30 + $0xb0] sm:$0xf]  ;;  %v1041_v3 = vor.u32 %v1139_v60, %v1038_v61  ;;  %v1123_v6 = vld [vmem:[%s1274_s30 + $0x54] sm:$0xf] }
  0x1c   : > { %v1136_v2 = vld [vmem:[%s1274_s30 + $0xb4] sm:$0xf0]  ;;  %v957_v4 = vor.u32 %v1120_v0, %v956_v63  ;;  %v974_v7 = vld [vmem:[%s1274_s30 + $0x58] sm:$0xf0]  ;;  %v1141_v8 = vld [vmem:[%s1274_s30 + $0xe4] sm:$0xf] }
  0x1d   : > { %545 = vmatpush.bf16.msra.mxu0 %v1148_v18  ;;  %1158 = vmatpush.bf16.msra.mxu2 %v1148_v18  ;;  %v1021_v5 = vor.u32 %v1136_v2, %v1020_v1  ;;  %v1046_v9 = vld [vmem:[%s1274_s30 + $0xe8] sm:$0xf0]  ;;  %v977_v10 = vor.u32 %v1123_v6, %v974_v7  ;;  %v964_v11 = vld [vmem:[%s1274_s30 + $0x40] sm:$0xf]  ;;  %v1122_v12 = vld [vmem:[%s1274_s30 + $0x44] sm:$0xf0] }
  0x1e   : > { %v1028_v13 = vld [vmem:[%s1274_s30 + $0xc0] sm:$0xf]  ;;  %v1138_v14 = vld [vmem:[%s1274_s30 + $0xc4] sm:$0xf0]  ;;  %v1049_v15 = vor.u32 %v1141_v8, %v1046_v9  ;;  %v965_v16 = vor.u32 %v1122_v12, %v964_v11  ;;  %v1125_v18 = vld [vmem:[%s1274_s30 + $0x64] sm:$0xf] }
  0x1f   : > { %v1029_v17 = vor.u32 %v1138_v14, %v1028_v13  ;;  %v1054_v21 = vld [vmem:[%s1274_s30 + $0xf8] sm:$0xf0]  ;;  %v972_v23 = vld [vmem:[%s1274_s30 + $0x50] sm:$0xf]  ;;  %v1124_v24 = vld [vmem:[%s1274_s30 + $0x54] sm:$0xf0] }
  0x20   : > { %v973_v28 = vor.u32 %v1124_v24, %v972_v23  ;;  %v1127_v30 = vld [vmem:[%s1274_s30 + $0x74] sm:$0xf]  ;;  %v1126_v34 = vld [vmem:[%s1274_s30 + $0x64] sm:$0xf0]  ;;  %v1044_v35 = vld [vmem:[%s1274_s30 + $0xe0] sm:$0xf] }
  0x21   : > { %546 = vmatpush.bf16.msra.mxu0 %v1147_v19  ;;  %1159 = vmatpush.bf16.msra.mxu2 %v1147_v19  ;;  %v982_v19 = vld [vmem:[%s1274_s30 + $0x68] sm:$0xf0]  ;;  %v1142_v36 = vld [vmem:[%s1274_s30 + $0xe4] sm:$0xf0]  ;;  %v1129_v39 = vld [vmem:[%s1274_s30 + $0x84] sm:$0xf] }
  0x22   : > { %v985_v22 = vor.u32 %v1125_v18, %v982_v19  ;;  %v998_v40 = vld [vmem:[%s1274_s30 + $0x88] sm:$0xf0]  ;;  %v988_v42 = vld [vmem:[%s1274_s30 + $0x70] sm:$0xf]  ;;  %v1144_v46 = vld [vmem:[%s1274_s30 + $0xf4] sm:$0xf0] }
  0x23   : > { %v1001_v41 = vor.u32 %v1129_v39, %v998_v40  ;;  %v1374_v51 = vld [vmem:[%s1495_s2] ss:$0 sm:$0xff] }
  0x25   : > { %547 = vmatpush.bf16.msra.mxu0 %v1146_v20  ;;  %1160 = vmatpush.bf16.msra.mxu2 %v1146_v20  ;;  %v1143_v20 = vld [vmem:[%s1274_s30 + $0xf4] sm:$0xf] }
  0x26   : > { %v1057_v27 = vor.u32 %v1143_v20, %v1054_v21 }
  0x29   : > { %548 = vmatpush.bf16.msra.mxu0 %v1145_v26  ;;  %1161 = vmatpush.bf16.msra.mxu2 %v1145_v26  ;;  %v1140_v26 = vld [vmem:[%s1274_s30 + $0xd4] sm:$0xf0] }
  0x2a   : > { %1095 = vmatmul.msk.bf16.gmra.mxu1 %vm485_vm2, %v945_v25  ;;  %1104 = vmatmul.msk.bf16.gmra.mxu3 %vm485_vm2, %v1017_v31  ;;  %v1036_v25 = vld [vmem:[%s1274_s30 + $0xd0] sm:$0xf]  ;;  %v990_v31 = vld [vmem:[%s1274_s30 + $0x78] sm:$0xf0] }
  0x2b   : > { %v1037_v29 = vor.u32 %v1140_v26, %v1036_v25 }
  0x2c   : > { %549 = vmatmul.bf16.vlgmr.msra.gmra.mxu0 %v933_v32  ;;  %589 = vmatmul.bf16.vlgmr.msra.gmra.mxu2 %v997_v33  ;;  %v993_v32 = vor.u32 %v1127_v30, %v990_v31  ;;  %v980_v33 = vld [vmem:[%s1274_s30 + $0x60] sm:$0xf] }
  0x2d   : > { %v981_v37 = vor.u32 %v1126_v34, %v980_v33 }
  0x3a   : > { %1096 = vmatmul.msk.bf16.gmra.mxu1 %vm485_vm2, %v953_v38  ;;  %1105 = vmatmul.msk.bf16.gmra.mxu3 %vm485_vm2, %v1025_v43  ;;  %v1045_v38 = vor.u32 %v1142_v36, %v1044_v35  ;;  %v1128_v43 = vld [vmem:[%s1274_s30 + $0x74] sm:$0xf0] }
  0x3b   : > { %v989_v47 = vor.u32 %v1128_v43, %v988_v42 }
  0x3c   : > { %554 = vmatmul.bf16.gmra.mxu0 %v941_v44  ;;  %594 = vmatmul.bf16.gmra.mxu2 %v1005_v45  ;;  %v1052_v45 = vld [vmem:[%s1274_s30 + $0xf0] sm:$0xf] }
  0x3d   : > { %v1053_v48 = vor.u32 %v1144_v46, %v1052_v45 }
  0x4a   : > { %1097 = vmatmul.msk.bf16.gmra.mxu1 %vm485_vm2, %v961_v50  ;;  %1106 = vmatmul.msk.bf16.gmra.mxu3 %vm485_vm2, %v1033_v55 }
  0x4c   : > { %559 = vmatmul.bf16.gmra.mxu0 %v949_v56  ;;  %599 = vmatmul.bf16.gmra.mxu2 %v1013_v57 }
  0x5a   : > { %1098 = vmatmul.msk.bf16.gmra.mxu1 %vm485_vm2, %v969_v62  ;;  %1107 = vmatmul.msk.bf16.gmra.mxu3 %vm485_vm2, %v1041_v3 }
  0x5c   : > { %564 = vmatmul.bf16.gmra.mxu0 %v957_v4  ;;  %604 = vmatmul.bf16.gmra.mxu2 %v1021_v5 }
  0x6a   : > { %1099 = vmatmul.msk.bf16.gmra.mxu1 %vm485_vm2, %v977_v10  ;;  %1108 = vmatmul.msk.bf16.gmra.mxu3 %vm485_vm2, %v1049_v15 }
  0x6c   : > { %569 = vmatmul.bf16.gmra.mxu0 %v965_v16  ;;  %609 = vmatmul.bf16.gmra.mxu2 %v1029_v17 }
  0x7a   : > { %1100 = vmatmul.msk.bf16.gmra.mxu1 %vm485_vm2, %v985_v22  ;;  %1109 = vmatmul.msk.bf16.gmra.mxu3 %vm485_vm2, %v1057_v27 }
  0x7c   : > { %574 = vmatmul.bf16.gmra.mxu0 %v973_v28  ;;  %614 = vmatmul.bf16.gmra.mxu2 %v1037_v29 }
  0x8a   : > { %1101 = vmatmul.msk.bf16.gmra.mxu1 %vm485_vm2, %v993_v32 }
  0x8c   : > { %579 = vmatmul.bf16.gmra.mxu0 %v981_v37  ;;  %619 = vmatmul.bf16.gmra.mxu2 %v1045_v38 }
  0x97   : > { %v639_v44 = vpop.f32.mrf.mxu1 }
  0x9a   : > { %1102 = vmatmul.msk.bf16.gmra.mxu1 %vm485_vm2, %v1001_v41 }
  0x9c   : > { %584 = vmatmul.bf16.gmra.mxu0 %v989_v47  ;;  %624 = vmatmul.bf16.gmra.mxu2 %v1053_v48 }
  0x9d   : > { %v684_v52 = vpop.f32.mrf.mxu3 }
  0x9f   : > { %v641_v49 = vpop.f32.mrf.mxu1 }
  0xa5   : > { %v686_v62 = vpop.f32.mrf.mxu3 }
  0xa7   : > { %v644_v50 = vpop.f32.mrf.mxu1 }
  0xa9   : > { %v550_v53 = vpop.f32.mrf.mxu0 }
  0xaa   : > { %v551_v54 = vadd.f32 %v1374_v51, %v550_v53 }
  0xac   : > { %v640_v55 = vadd.f32 %v639_v44, %v551_v54 }
  0xad   : > { %v689_v7 = vpop.f32.mrf.mxu3 }
  0xae   : > { %v719_v56 = vmax.f32 %v640_v55, 0.0 }
  0xaf   : > { %v646_v57 = vpop.f32.mrf.mxu1  ;;  %v1383_v59 = vpop.f32.mrf.mxu2 }
  0xb0   : > { %v751_v58 = vpack.c.bf16 %v719_v56, %v719_v56 }
  0xb1   : > { %v552_v60 = vpop.f32.mrf.mxu0 }
  0xb2   : > { %784 = vst.msk [vmem:[%s1381_s23] sm:$0xf] %vm783_vm3, %v751_v58  ;;  %v553_v61 = vadd.f32 %v1374_v51, %v552_v60 }
  0xb4   : > { %v642_v63 = vadd.f32 %v641_v49, %v553_v61 }
  0xb5   : > { %v691_v20 = vpop.f32.mrf.mxu3 }
  0xb6   : > { %v720_v0 = vmax.f32 %v642_v63, 0.0 }
  0xb7   : > { %v649_v1 = vpop.f32.mrf.mxu1  ;;  %v1388_v3 = vpop.f32.mrf.mxu2 }
  0xb8   : > { %v752_v2 = vpack.c.bf16 %v720_v0, %v720_v0 }
  0xb9   : > { %v555_v4 = vpop.f32.mrf.mxu0 }
  0xba   : > { %785 = vst.msk [vmem:[%s1381_s23 + $0x4] sm:$0xf] %vm783_vm3, %v752_v2  ;;  %v556_v5 = vadd.f32 %v1374_v51, %v555_v4 }
  0xbc   : > { %v645_v6 = vadd.f32 %v644_v50, %v556_v5 }
  0xbd   : > { %v694_v35 = vpop.f32.mrf.mxu3 }
  0xbe   : > { %v721_v8 = vmax.f32 %v645_v6, 0.0 }
  0xbf   : > { %v651_v9 = vpop.f32.mrf.mxu1  ;;  %v595_v11 = vpop.f32.mrf.mxu2 }
  0xc0   : > { %v753_v10 = vpack.c.bf16 %v721_v8, %v721_v8  ;;  %v596_v12 = vadd.f32 %v1374_v51, %v595_v11 }
  0xc1   : > { %v557_v13 = vpop.f32.mrf.mxu0 }
  0xc2   : > { %786 = vst.msk [vmem:[%s1381_s23 + $0x8] sm:$0xf] %vm783_vm3, %v753_v10  ;;  %v558_v14 = vadd.f32 %v1374_v51, %v557_v13  ;;  %v685_v15 = vadd.f32 %v684_v52, %v596_v12 }
  0xc4   : > { %v647_v16 = vadd.f32 %v646_v57, %v558_v14  ;;  %v737_v17 = vmax.f32 %v685_v15, 0.0 }
  0xc5   : > { %v696_v50 = vpop.f32.mrf.mxu3 }
  0xc6   : > { %v722_v18 = vmax.f32 %v647_v16, 0.0  ;;  %v769_v21 = vpack.c.bf16 %v737_v17, %v737_v17 }
  0xc7   : > { %v654_v19 = vpop.f32.mrf.mxu1  ;;  %v597_v23 = vpop.f32.mrf.mxu2 }
  0xc8   : > { %v754_v22 = vpack.c.bf16 %v722_v18, %v722_v18  ;;  %802 = vst.msk [vmem:[%s1381_s23 + $0x48] sm:$0xf] %vm783_vm3, %v769_v21  ;;  %v598_v24 = vadd.f32 %v1374_v51, %v597_v23 }
  0xc9   : > { %v560_v25 = vpop.f32.mrf.mxu0 }
  0xca   : > { %787 = vst.msk [vmem:[%s1381_s23 + $0xc] sm:$0xf] %vm783_vm3, %v754_v22  ;;  %v561_v26 = vadd.f32 %v1374_v51, %v560_v25  ;;  %v687_v27 = vadd.f32 %v686_v62, %v598_v24 }
  0xcc   : > { %v650_v28 = vadd.f32 %v649_v1, %v561_v26  ;;  %v738_v29 = vmax.f32 %v687_v27, 0.0 }
  0xcd   : > { %v699_v2 = vpop.f32.mrf.mxu3 }
  0xce   : > { %v723_v30 = vmax.f32 %v650_v28, 0.0  ;;  %v770_v32 = vpack.c.bf16 %v738_v29, %v738_v29 }
  0xcf   : > { %v656_v31 = vpop.f32.mrf.mxu1  ;;  %v600_v34 = vpop.f32.mrf.mxu2 }
  0xd0   : > { %v755_v33 = vpack.c.bf16 %v723_v30, %v723_v30  ;;  %803 = vst.msk [vmem:[%s1381_s23 + $0x4c] sm:$0xf] %vm783_vm3, %v770_v32  ;;  %v601_v36 = vadd.f32 %v1374_v51, %v600_v34 }
  0xd1   : > { %v562_v37 = vpop.f32.mrf.mxu0 }
  0xd2   : > { %788 = vst.msk [vmem:[%s1381_s23 + $0x10] sm:$0xf] %vm783_vm3, %v755_v33  ;;  %v563_v38 = vadd.f32 %v1374_v51, %v562_v37  ;;  %v690_v39 = vadd.f32 %v689_v7, %v601_v36 }
  0xd4   : > { %v652_v40 = vadd.f32 %v651_v9, %v563_v38  ;;  %v739_v41 = vmax.f32 %v690_v39, 0.0 }
  0xd5   : > { %v701_v18 = vpop.f32.mrf.mxu3 }
  0xd6   : > { %v724_v42 = vmax.f32 %v652_v40, 0.0  ;;  %v771_v44 = vpack.c.bf16 %v739_v41, %v739_v41 }
  0xd7   : > { %v659_v43 = vpop.f32.mrf.mxu1  ;;  %v602_v46 = vpop.f32.mrf.mxu2 }
  0xd8   : > { %v756_v45 = vpack.c.bf16 %v724_v42, %v724_v42  ;;  %804 = vst.msk [vmem:[%s1381_s23 + $0x50] sm:$0xf] %vm783_vm3, %v771_v44  ;;  %v603_v47 = vadd.f32 %v1374_v51, %v602_v46 }
  0xd9   : > { %v565_v48 = vpop.f32.mrf.mxu0 }
  0xda   : > { %789 = vst.msk [vmem:[%s1381_s23 + $0x14] sm:$0xf] %vm783_vm3, %v756_v45  ;;  %v566_v49 = vadd.f32 %v1374_v51, %v565_v48  ;;  %v692_v52 = vadd.f32 %v691_v20, %v603_v47 }
  0xdc   : > { %v655_v53 = vadd.f32 %v654_v19, %v566_v49  ;;  %v740_v54 = vmax.f32 %v692_v52, 0.0 }
  0xdd   : > { %v704_v33 = vpop.f32.mrf.mxu3 }
  0xde   : > { %v725_v55 = vmax.f32 %v655_v53, 0.0  ;;  %v772_v57 = vpack.c.bf16 %v740_v54, %v740_v54 }
  0xdf   : > { %v661_v56 = vpop.f32.mrf.mxu1  ;;  %v605_v60 = vpop.f32.mrf.mxu2 }
  0xe0   : > { %v757_v58 = vpack.c.bf16 %v725_v55, %v725_v55  ;;  %805 = vst.msk [vmem:[%s1381_s23 + $0x54] sm:$0xf] %vm783_vm3, %v772_v57  ;;  %v606_v61 = vadd.f32 %v1374_v51, %v605_v60 }
  0xe1   : > { %v567_v62 = vpop.f32.mrf.mxu0 }
  0xe2   : > { %790 = vst.msk [vmem:[%s1381_s23 + $0x18] sm:$0xf] %vm783_vm3, %v757_v58  ;;  %v568_v63 = vadd.f32 %v1374_v51, %v567_v62  ;;  %v695_v0 = vadd.f32 %v694_v35, %v606_v61 }
  0xe4   : > { %v657_v1 = vadd.f32 %v656_v31, %v568_v63  ;;  %v741_v4 = vmax.f32 %v695_v0, 0.0 }
  0xe5   : > { %v706_v48 = vpop.f32.mrf.mxu3 }
  0xe6   : > { %v726_v5 = vmax.f32 %v657_v1, 0.0  ;;  %v773_v7 = vpack.c.bf16 %v741_v4, %v741_v4 }
  0xe7   : > { %v664_v6 = vpop.f32.mrf.mxu1  ;;  %v607_v9 = vpop.f32.mrf.mxu2 }
  0xe8   : > { %v758_v8 = vpack.c.bf16 %v726_v5, %v726_v5  ;;  %806 = vst.msk [vmem:[%s1381_s23 + $0x58] sm:$0xf] %vm783_vm3, %v773_v7  ;;  %v608_v10 = vadd.f32 %v1374_v51, %v607_v9 }
  0xe9   : > { %v570_v11 = vpop.f32.mrf.mxu0 }
  0xea   : > { %791 = vst.msk [vmem:[%s1381_s23 + $0x1c] sm:$0xf] %vm783_vm3, %v758_v8  ;;  %v571_v12 = vadd.f32 %v1374_v51, %v570_v11  ;;  %v697_v13 = vadd.f32 %v696_v50, %v608_v10 }
  0xec   : > { %v660_v14 = vadd.f32 %v659_v43, %v571_v12  ;;  %v742_v15 = vmax.f32 %v697_v13, 0.0  ;;  %v591_v13 = vadd.f32 %v1374_v51, %v1383_v59 }
  0xed   : > { %v709_v0 = vpop.f32.mrf.mxu3 }
  0xee   : > { %v727_v16 = vmax.f32 %v660_v14, 0.0  ;;  %v774_v19 = vpack.c.bf16 %v742_v15, %v742_v15 }
  0xef   : > { %v666_v17 = vpop.f32.mrf.mxu1  ;;  %v610_v21 = vpop.f32.mrf.mxu2 }
  0xf0   : > { %v759_v20 = vpack.c.bf16 %v727_v16, %v727_v16  ;;  %807 = vst.msk [vmem:[%s1381_s23 + $0x5c] sm:$0xf] %vm783_vm3, %v774_v19  ;;  %v611_v22 = vadd.f32 %v1374_v51, %v610_v21 }
  0xf1   : > { %v572_v23 = vpop.f32.mrf.mxu0 }
  0xf2   : > { %792 = vst.msk [vmem:[%s1381_s23 + $0x20] sm:$0xf] %vm783_vm3, %v759_v20  ;;  %v573_v24 = vadd.f32 %v1374_v51, %v572_v23  ;;  %v700_v25 = vadd.f32 %v699_v2, %v611_v22 }
  0xf4   : > { %v662_v26 = vadd.f32 %v661_v56, %v573_v24  ;;  %v743_v27 = vmax.f32 %v700_v25, 0.0 }
  0xf5   : > { %v711_v16 = vpop.f32.mrf.mxu3 }
  0xf6   : > { %v728_v28 = vmax.f32 %v662_v26, 0.0  ;;  %v775_v30 = vpack.c.bf16 %v743_v27, %v743_v27 }
  0xf7   : > { %v669_v29 = vpop.f32.mrf.mxu1  ;;  %v612_v32 = vpop.f32.mrf.mxu2 }
  0xf8   : > { %v760_v31 = vpack.c.bf16 %v728_v28, %v728_v28  ;;  %808 = vst.msk [vmem:[%s1381_s23 + $0x60] sm:$0xf] %vm783_vm3, %v775_v30  ;;  %v613_v34 = vadd.f32 %v1374_v51, %v612_v32  ;;  %v593_v28 = vadd.f32 %v1374_v51, %v1388_v3 }
  0xf9   : > { %v575_v35 = vpop.f32.mrf.mxu0 }
  0xfa   : > { %793 = vst.msk [vmem:[%s1381_s23 + $0x24] sm:$0xf] %vm783_vm3, %v760_v31  ;;  %v576_v36 = vadd.f32 %v1374_v51, %v575_v35  ;;  %v702_v37 = vadd.f32 %v701_v18, %v613_v34 }
  0xfc   : > { %v665_v38 = vadd.f32 %v664_v6, %v576_v36  ;;  %v744_v39 = vmax.f32 %v702_v37, 0.0 }
  0xfd   : > { %v714_v35 = vpop.f32.mrf.mxu3 }
  0xfe   : > { %v729_v40 = vmax.f32 %v665_v38, 0.0  ;;  %v776_v42 = vpack.c.bf16 %v744_v39, %v744_v39 }
  0xff   : > { %v671_v41 = vpop.f32.mrf.mxu1  ;;  %v615_v44 = vpop.f32.mrf.mxu2 }
 0x100   : > { %v761_v43 = vpack.c.bf16 %v729_v40, %v729_v40  ;;  %809 = vst.msk [vmem:[%s1381_s23 + $0x64] sm:$0xf] %vm783_vm3, %v776_v42  ;;  %v616_v45 = vadd.f32 %v1374_v51, %v615_v44 }
 0x101   : > { %v577_v46 = vpop.f32.mrf.mxu0 }
 0x102   : > { %794 = vst.msk [vmem:[%s1381_s23 + $0x28] sm:$0xf] %vm783_vm3, %v761_v43  ;;  %v578_v47 = vadd.f32 %v1374_v51, %v577_v46  ;;  %v705_v49 = vadd.f32 %v704_v33, %v616_v45 }
 0x104   : > { %v667_v50 = vadd.f32 %v666_v17, %v578_v47  ;;  %v745_v52 = vmax.f32 %v705_v49, 0.0 }
 0x105   : > { %v716_v49 = vpop.f32.mrf.mxu3 }
 0x106   : > { %v730_v53 = vmax.f32 %v667_v50, 0.0  ;;  %v777_v55 = vpack.c.bf16 %v745_v52, %v745_v52 }
 0x107   : > { %v674_v54 = vpop.f32.mrf.mxu1  ;;  %v617_v57 = vpop.f32.mrf.mxu2 }
 0x108   : > { %v762_v56 = vpack.c.bf16 %v730_v53, %v730_v53  ;;  %810 = vst.msk [vmem:[%s1381_s23 + $0x68] sm:$0xf] %vm783_vm3, %v777_v55  ;;  %v618_v58 = vadd.f32 %v1374_v51, %v617_v57 }
 0x109   : > { %v580_v60 = vpop.f32.mrf.mxu0 }
 0x10a   : > { %795 = vst.msk [vmem:[%s1381_s23 + $0x2c] sm:$0xf] %vm783_vm3, %v762_v56  ;;  %v581_v61 = vadd.f32 %v1374_v51, %v580_v60  ;;  %v707_v62 = vadd.f32 %v706_v48, %v618_v58 }
 0x10c   : > { %v670_v63 = vadd.f32 %v669_v29, %v581_v61  ;;  %v746_v1 = vmax.f32 %v707_v62, 0.0 }
 0x10e   : > { %v731_v2 = vmax.f32 %v670_v63, 0.0  ;;  %v778_v5 = vpack.c.bf16 %v746_v1, %v746_v1 }
 0x10f   : > { %v676_v4 = vpop.f32.mrf.mxu1  ;;  %v620_v7 = vpop.f32.mrf.mxu2 }
 0x110   : > { %v763_v6 = vpack.c.bf16 %v731_v2, %v731_v2  ;;  %811 = vst.msk [vmem:[%s1381_s23 + $0x6c] sm:$0xf] %vm783_vm3, %v778_v5  ;;  %v621_v8 = vadd.f32 %v1374_v51, %v620_v7 }
 0x111   : > { %v582_v9 = vpop.f32.mrf.mxu0 }
 0x112   : > { %796 = vst.msk [vmem:[%s1381_s23 + $0x30] sm:$0xf] %vm783_vm3, %v763_v6  ;;  %v583_v10 = vadd.f32 %v1374_v51, %v582_v9  ;;  %v710_v11 = vadd.f32 %v709_v0, %v621_v8 }
 0x114   : > { %v672_v12 = vadd.f32 %v671_v41, %v583_v10  ;;  %v747_v14 = vmax.f32 %v710_v11, 0.0 }
 0x116   : > { %v732_v15 = vmax.f32 %v672_v12, 0.0  ;;  %v779_v18 = vpack.c.bf16 %v747_v14, %v747_v14 }
 0x117   : > { %v679_v17 = vpop.f32.mrf.mxu1  ;;  %v622_v21 = vpop.f32.mrf.mxu2 }
 0x118   : > { %v680_v19 = vadd.f32 %v679_v17, %v591_v13  ;;  %v764_v20 = vpack.c.bf16 %v732_v15, %v732_v15  ;;  %812 = vst.msk [vmem:[%s1381_s23 + $0x70] sm:$0xf] %vm783_vm3, %v779_v18  ;;  %v623_v23 = vadd.f32 %v1374_v51, %v622_v21 }
 0x119   : > { %v585_v24 = vpop.f32.mrf.mxu0 }
 0x11a   : > { %v735_v22 = vmax.f32 %v680_v19, 0.0  ;;  %797 = vst.msk [vmem:[%s1381_s23 + $0x34] sm:$0xf] %vm783_vm3, %v764_v20  ;;  %v586_v59 = vadd.f32 %v1374_v51, %v585_v24  ;;  %v712_v26 = vadd.f32 %v711_v16, %v623_v23 }
 0x11c   : > { %v767_v25 = vpack.c.bf16 %v735_v22, %v735_v22  ;;  %v675_v27 = vadd.f32 %v674_v54, %v586_v59  ;;  %v748_v29 = vmax.f32 %v712_v26, 0.0 }
 0x11e   : > { %800 = vst.msk [vmem:[%s1381_s23 + $0x40] sm:$0xf] %vm783_vm3, %v767_v25  ;;  %v733_v30 = vmax.f32 %v675_v27, 0.0  ;;  %v780_v32 = vpack.c.bf16 %v748_v29, %v748_v29 }
 0x11f   : > { %v681_v31 = vpop.f32.mrf.mxu1  ;;  %v625_v36 = vpop.f32.mrf.mxu2 }
 0x120   : > { %v682_v33 = vadd.f32 %v681_v31, %v593_v28  ;;  %v765_v34 = vpack.c.bf16 %v733_v30, %v733_v30  ;;  %813 = vst.msk [vmem:[%s1381_s23 + $0x74] sm:$0xf] %vm783_vm3, %v780_v32  ;;  %v626_v38 = vadd.f32 %v1374_v51, %v625_v36 }
 0x121   : > { %v587_v39 = vpop.f32.mrf.mxu0 }
 0x122   : > { %v736_v37 = vmax.f32 %v682_v33, 0.0  ;;  %798 = vst.msk [vmem:[%s1381_s23 + $0x38] sm:$0xf] %vm783_vm3, %v765_v34  ;;  %v588_v3 = vadd.f32 %v1374_v51, %v587_v39  ;;  %v715_v41 = vadd.f32 %v714_v35, %v626_v38 }
 0x124   : > { %v768_v40 = vpack.c.bf16 %v736_v37, %v736_v37  ;;  %v677_v42 = vadd.f32 %v676_v4, %v588_v3  ;;  %v749_v43 = vmax.f32 %v715_v41, 0.0 }
 0x126   : > { %801 = vst.msk [vmem:[%s1381_s23 + $0x44] sm:$0xf] %vm783_vm3, %v768_v40  ;;  %v734_v44 = vmax.f32 %v677_v42, 0.0  ;;  %v781_v45 = vpack.c.bf16 %v749_v43, %v749_v43 }
 0x127   : > { %v627_v47 = vpop.f32.mrf.mxu2 }
 0x128   : > { %v766_v46 = vpack.c.bf16 %v734_v44, %v734_v44  ;;  %814 = vst.msk [vmem:[%s1381_s23 + $0x78] sm:$0xf] %vm783_vm3, %v781_v45  ;;  %v628_v48 = vadd.f32 %v1374_v51, %v627_v47 }
 0x12a   : > { %799 = vst.msk [vmem:[%s1381_s23 + $0x3c] sm:$0xf] %vm783_vm3, %v766_v46  ;;  %v717_v50 = vadd.f32 %v716_v49, %v628_v48 }
 0x12c   : > { %v750_v52 = vmax.f32 %v717_v50, 0.0 }
 0x12e   : > { %v782_v53 = vpack.c.bf16 %v750_v52, %v750_v52 }
 0x130   : > { %815 = vst.msk [vmem:[%s1381_s23 + $0x7c] sm:$0xf] %vm783_vm3, %v782_v53 }
 0x131 PF: > { %s13_s14 = sadd.s32 1, %s1212_s14   ;;  %s1497_s12 = smov %s1208_s13 }
 0x132   : > { %p10_p5 = scmp.ge.s32.totalorder %s13_s14, 10   ;;  %s1498_s13 = smov %s1500_s15 }
 0x134   :  { %12 = sbr.rel (!%p10_p5) target bundleno = 2 (0x2), region = 68 }

</bundles_post_ra>
